<compile_context>
chip_gen: v5e
topology: v5e:2x2
jax: 0.10.0
libtpu: 0.0.40
codegen_flags: <defaults>
</compile_context>

<pallas_src>
import functools

import jax
import jax.numpy as jnp
from jax.experimental import pallas as pl
from jax.experimental.pallas import tpu as pltpu

_LANE = 128
_SUBLANE = 8
_VMEM_SPEC = pl.BlockSpec(memory_space=pltpu.MemorySpace.VMEM)


def _round_up(x, m):
    return ((x + m - 1) // m) * m


def _pad2d(x, rows, cols):
    return jnp.pad(x, ((0, rows - x.shape[0]), (0, cols - x.shape[1])))


# ------------------------------ fused kernel --------------------------------

def _gcn_fused_kernel(*refs, num_convs, num_mlp):
    """Whole GCN forward in one kernel invocation (no grid).

    refs = (a_hat, x, conv_w[0..num_convs-1], pool,
            (mlp_w, mlp_b) * num_mlp, out)

    a_hat, x, conv_w, pool, mlp_w are bf16 (MXU inputs); mlp_b and the output
    are f32.  All accumulation is f32.
    """
    bf16 = jnp.bfloat16
    f32 = jnp.float32

    it = iter(refs)
    a_ref = next(it)
    x_ref = next(it)
    conv_w_refs = [next(it) for _ in range(num_convs)]
    p_ref = next(it)
    mlp_refs = [(next(it), next(it)) for _ in range(num_mlp)]
    o_ref = next(it)

    a = a_ref[...]                                           # [Np, Np] bf16

    def conv(h_bf, w_ref):
        # A_hat @ (H @ W), bf16 operands, f32 accumulation on the MXU.
        xw = jnp.dot(h_bf, w_ref[...], preferred_element_type=f32)
        return jnp.dot(a, xw.astype(bf16), preferred_element_type=f32)

    # conv stack: relu applied to the INPUT of convs[1:], not after the last.
    h = conv(x_ref[...], conv_w_refs[0])
    for w_ref in conv_w_refs[1:]:
        h = conv(jnp.maximum(h, 0.0).astype(bf16), w_ref)

    # global mean pool fused into the epilogue: Z = P @ H   [Gp, Hp] f32
    z = jnp.dot(p_ref[...], h.astype(bf16), preferred_element_type=f32)

    # MLP head: first layer without input relu, the rest with relu on input.
    w_ref, b_ref = mlp_refs[0]
    z = jnp.dot(z.astype(bf16), w_ref[...], preferred_element_type=f32) + b_ref[...]
    for w_ref, b_ref in mlp_refs[1:]:
        z = (jnp.dot(jnp.maximum(z, 0.0).astype(bf16), w_ref[...],
                     preferred_element_type=f32) + b_ref[...])

    o_ref[...] = z.astype(o_ref.dtype)


# ------------------------------ model wrapper --------------------------------

def gcn_forward(a_hat, x, conv_ws, pool_mat, mlp_ws, mlp_bs,
                num_graphs, out_channels):
    """Pads/casts operands, runs the fused kernel once, slices the result."""
    bf16 = jnp.bfloat16
    n = a_hat.shape[0]
    n_p = _round_up(n, _LANE)                 # N is a lane dim for A_hat / P
    g_p = _round_up(num_graphs, _SUBLANE)

    f_in_p = _round_up(x.shape[1], _LANE)
    hid_p = _round_up(conv_ws[0].shape[1], _LANE)
    out_p = _round_up(out_channels, _LANE)

    a_p = _pad2d(a_hat, n_p, n_p).astype(bf16)
    x_p = _pad2d(x, n_p, f_in_p).astype(bf16)
    p_p = _pad2d(pool_mat, g_p, n_p).astype(bf16)

    conv_dims_in = [f_in_p] + [hid_p] * (len(conv_ws) - 1)
    conv_ws_p = [_pad2d(w, d_in, hid_p).astype(bf16)
                 for w, d_in in zip(conv_ws, conv_dims_in)]

    mlp_out_dims = [hid_p] * (len(mlp_ws) - 1) + [out_p]
    mlp_ws_p = [_pad2d(w, hid_p, d_out).astype(bf16)
                for w, d_out in zip(mlp_ws, mlp_out_dims)]
    # biases kept in f32; pre-broadcast to the padded graph rows
    mlp_bs_p = [jnp.broadcast_to(_pad2d(b, 1, d_out), (g_p, d_out)).astype(jnp.float32)
                for b, d_out in zip(mlp_bs, mlp_out_dims)]

    mlp_flat = []
    for w, b in zip(mlp_ws_p, mlp_bs_p):
        mlp_flat += [w, b]

    inputs = [a_p, x_p, *conv_ws_p, p_p, *mlp_flat]

    out_padded = pl.pallas_call(
        functools.partial(_gcn_fused_kernel,
                          num_convs=len(conv_ws), num_mlp=len(mlp_ws)),
        out_shape=jax.ShapeDtypeStruct((g_p, out_p), jnp.float32),
        in_specs=[_VMEM_SPEC] * len(inputs),
        out_specs=_VMEM_SPEC,
        compiler_params=pltpu.CompilerParams(
            vmem_limit_bytes=32 * 1024 * 1024),
    )(*inputs)

    return out_padded[:num_graphs, :out_channels]


# ------------------------------- graph glue ----------------------------------

def build_normalized_adjacency(edge_index, num_nodes):
    """Dense D^-1/2 (A + I) D^-1/2 matching GCNConv default normalization."""
    src, dst = edge_index
    a = jnp.zeros((num_nodes, num_nodes), jnp.float32)
    a = a.at[src, dst].set(1.0)
    a = a.at[dst, src].set(1.0)                       # undirected
    a = a + jnp.eye(num_nodes, dtype=jnp.float32)     # self loops
    deg = a.sum(axis=1)
    d_inv_sqrt = jnp.where(deg > 0, 1.0 / jnp.sqrt(deg), 0.0)
    return a * d_inv_sqrt[:, None] * d_inv_sqrt[None, :]


def build_pool_matrix(batch, num_graphs):
    """P[g, n] = 1/|V_g| if node n belongs to graph g else 0."""
    onehot = (batch[None, :] == jnp.arange(num_graphs)[:, None]).astype(jnp.float32)
    counts = onehot.sum(axis=1, keepdims=True)
    return onehot / jnp.maximum(counts, 1.0)


def init_params(key, num_layers, in_channels, hid_channels, out_channels,
                num_mlp_layers):
    keys = jax.random.split(key, num_layers + 2 * num_mlp_layers)
    ki = iter(keys)

    conv_ws = []
    dims_in = [in_channels] + [hid_channels] * (num_layers - 1)
    for d_in in dims_in:
        scale = jnp.sqrt(6.0 / (d_in + hid_channels))     # glorot-style
        conv_ws.append(jax.random.uniform(next(ki), (d_in, hid_channels),
                                          jnp.float32, -scale, scale))

    mlp_ws, mlp_bs = [], []
    mlp_dims = [(hid_channels, hid_channels)] * (num_mlp_layers - 1)
    mlp_dims += [(hid_channels, out_channels)]
    for d_in, d_out in mlp_dims:
        scale = 1.0 / jnp.sqrt(jnp.float32(d_in))
        # stored already transposed: [d_in, d_out]
        mlp_ws.append(jax.random.uniform(next(ki), (d_in, d_out),
                                         jnp.float32, -scale, scale))
        mlp_bs.append(jax.random.uniform(next(ki), (1, d_out),
                                         jnp.float32, -scale, scale))
    return conv_ws, mlp_ws, mlp_bs


def reference_forward(a_hat, x, conv_ws, pool_mat, mlp_ws, mlp_bs):
    """Pure-JAX reference mirroring the kernel's bf16/f32 cast points."""
    bf16 = jnp.bfloat16
    f32 = jnp.float32
    dot = lambda a, b: jax.lax.dot(a, b, preferred_element_type=f32)

    a = a_hat.astype(bf16)
    h_in = x.astype(bf16)
    h = dot(a, dot(h_in, conv_ws[0].astype(bf16)).astype(bf16))
    for w in conv_ws[1:]:
        h_in = jnp.maximum(h, 0.0).astype(bf16)
        h = dot(a, dot(h_in, w.astype(bf16)).astype(bf16))
    z = dot(pool_mat.astype(bf16), h.astype(bf16))
    z = dot(z.astype(bf16), mlp_ws[0].astype(bf16)) + mlp_bs[0].astype(f32)
    for w, b in zip(mlp_ws[1:], mlp_bs[1:]):
        z = dot(jnp.maximum(z, 0.0).astype(bf16), w.astype(bf16)) + b.astype(f32)
    return z


# ---------------------------------- main -------------------------------------

if __name__ == "__main__":
    num_layers = 3
    in_channels = 16
    hid_channels = 32
    out_channels = 8
    num_mlp_layers = 2

    num_graphs = 2
    nodes_per_graph = 32
    num_nodes = num_graphs * nodes_per_graph          # 64

    key = jax.random.PRNGKey(0)
    k_feat, k_e1, k_e2, k_param = jax.random.split(key, 4)

    # Node features x: [N, in_channels]
    x = jax.random.normal(k_feat, (num_nodes, in_channels), jnp.float32)

    # batch assignment: first 32 nodes -> graph 0, next 32 -> graph 1
    batch = jnp.repeat(jnp.arange(num_graphs), nodes_per_graph)

    # Edges: a ring inside each graph plus random strictly intra-graph chords
    src_list, dst_list = [], []
    for g in range(num_graphs):
        base = g * nodes_per_graph
        for i in range(nodes_per_graph):
            src_list.append(base + i)
            dst_list.append(base + (i + 1) % nodes_per_graph)
    src = jnp.array(src_list, jnp.int32)
    dst = jnp.array(dst_list, jnp.int32)
    offsets = (jnp.arange(num_graphs) * nodes_per_graph)[:, None]
    extra_src = jax.random.randint(k_e1, (num_graphs, 8), 0, nodes_per_graph) + offsets
    extra_dst = jax.random.randint(k_e2, (num_graphs, 8), 0, nodes_per_graph) + offsets
    src = jnp.concatenate([src, extra_src.reshape(-1).astype(jnp.int32)])
    dst = jnp.concatenate([dst, extra_dst.reshape(-1).astype(jnp.int32)])
    edge_index = jnp.stack([src, dst])

    a_hat = build_normalized_adjacency(edge_index, num_nodes)
    pool_mat = build_pool_matrix(batch, num_graphs)

    conv_ws, mlp_ws, mlp_bs = init_params(
        k_param, num_layers, in_channels, hid_channels, out_channels,
        num_mlp_layers)

    fwd = jax.jit(functools.partial(gcn_forward,
                                    num_graphs=num_graphs,
                                    out_channels=out_channels))
    out = fwd(a_hat, x, conv_ws, pool_mat, mlp_ws, mlp_bs)
    out = jax.block_until_ready(out)

    ref = reference_forward(a_hat, x, conv_ws, pool_mat, mlp_ws, mlp_bs)

    assert out.shape == (num_graphs, out_channels)
    assert jnp.allclose(out, ref, atol=5e-3, rtol=5e-3), (
        f"max abs diff {jnp.max(jnp.abs(out - ref))}")
    print("KERNEL_OK")
</pallas_src>

<mosaic_0001>
module attributes {stable_mosaic.version = 11 : i64} {
  func.func @_gcn_fused_kernel(%arg0: memref<128x128xbf16, #tpu.memory_space<vmem>>, %arg1: memref<128x128xbf16, #tpu.memory_space<vmem>>, %arg2: memref<128x128xbf16, #tpu.memory_space<vmem>>, %arg3: memref<128x128xbf16, #tpu.memory_space<vmem>>, %arg4: memref<128x128xbf16, #tpu.memory_space<vmem>>, %arg5: memref<8x128xbf16, #tpu.memory_space<vmem>>, %arg6: memref<128x128xbf16, #tpu.memory_space<vmem>>, %arg7: memref<8x128xf32, #tpu.memory_space<vmem>>, %arg8: memref<128x128xbf16, #tpu.memory_space<vmem>>, %arg9: memref<8x128xf32, #tpu.memory_space<vmem>>, %arg10: memref<8x128xf32, #tpu.memory_space<vmem>>) attributes {dimension_semantics = [], scalar_prefetch = 0 : i64, scratch_operands = 0 : i64, tpu.core_type = #tpu.core_type<tc>} {
    %c0 = arith.constant 0 : index
    %c0_0 = arith.constant 0 : index
    %0 = vector.load %arg0[%c0, %c0_0] : memref<128x128xbf16, #tpu.memory_space<vmem>>, vector<128x128xbf16>
    %c0_1 = arith.constant 0 : index
    %c0_2 = arith.constant 0 : index
    %1 = vector.load %arg1[%c0_1, %c0_2] : memref<128x128xbf16, #tpu.memory_space<vmem>>, vector<128x128xbf16>
    %c0_3 = arith.constant 0 : index
    %c0_4 = arith.constant 0 : index
    %2 = vector.load %arg2[%c0_3, %c0_4] : memref<128x128xbf16, #tpu.memory_space<vmem>>, vector<128x128xbf16>
    %cst = arith.constant dense<0.000000e+00> : vector<128x128xf32>
    %3 = tpu.matmul %1, %2, %cst {dimension_numbers = #tpu.dot_dimension_numbers<[1], [0], [0], [1], [0, 0, 1, 1], [], []>} : vector<128x128xbf16>, vector<128x128xbf16>, vector<128x128xf32> -> vector<128x128xf32>
    %4 = arith.truncf %3 : vector<128x128xf32> to vector<128x128xbf16>
    %cst_5 = arith.constant dense<0.000000e+00> : vector<128x128xf32>
    %5 = tpu.matmul %0, %4, %cst_5 {dimension_numbers = #tpu.dot_dimension_numbers<[1], [0], [0], [1], [0, 0, 1, 1], [], []>} : vector<128x128xbf16>, vector<128x128xbf16>, vector<128x128xf32> -> vector<128x128xf32>
    %cst_6 = arith.constant 0.000000e+00 : f32
    %6 = vector.broadcast %cst_6 : f32 to vector<128x128xf32>
    %7 = arith.maximumf %5, %6 : vector<128x128xf32>
    %8 = arith.truncf %7 : vector<128x128xf32> to vector<128x128xbf16>
    %c0_7 = arith.constant 0 : index
    %c0_8 = arith.constant 0 : index
    %9 = vector.load %arg3[%c0_7, %c0_8] : memref<128x128xbf16, #tpu.memory_space<vmem>>, vector<128x128xbf16>
    %cst_9 = arith.constant dense<0.000000e+00> : vector<128x128xf32>
    %10 = tpu.matmul %8, %9, %cst_9 {dimension_numbers = #tpu.dot_dimension_numbers<[1], [0], [0], [1], [0, 0, 1, 1], [], []>} : vector<128x128xbf16>, vector<128x128xbf16>, vector<128x128xf32> -> vector<128x128xf32>
    %11 = arith.truncf %10 : vector<128x128xf32> to vector<128x128xbf16>
    %cst_10 = arith.constant dense<0.000000e+00> : vector<128x128xf32>
    %12 = tpu.matmul %0, %11, %cst_10 {dimension_numbers = #tpu.dot_dimension_numbers<[1], [0], [0], [1], [0, 0, 1, 1], [], []>} : vector<128x128xbf16>, vector<128x128xbf16>, vector<128x128xf32> -> vector<128x128xf32>
    %cst_11 = arith.constant 0.000000e+00 : f32
    %13 = vector.broadcast %cst_11 : f32 to vector<128x128xf32>
    %14 = arith.maximumf %12, %13 : vector<128x128xf32>
    %15 = arith.truncf %14 : vector<128x128xf32> to vector<128x128xbf16>
    %c0_12 = arith.constant 0 : index
    %c0_13 = arith.constant 0 : index
    %16 = vector.load %arg4[%c0_12, %c0_13] : memref<128x128xbf16, #tpu.memory_space<vmem>>, vector<128x128xbf16>
    %cst_14 = arith.constant dense<0.000000e+00> : vector<128x128xf32>
    %17 = tpu.matmul %15, %16, %cst_14 {dimension_numbers = #tpu.dot_dimension_numbers<[1], [0], [0], [1], [0, 0, 1, 1], [], []>} : vector<128x128xbf16>, vector<128x128xbf16>, vector<128x128xf32> -> vector<128x128xf32>
    %18 = arith.truncf %17 : vector<128x128xf32> to vector<128x128xbf16>
    %cst_15 = arith.constant dense<0.000000e+00> : vector<128x128xf32>
    %19 = tpu.matmul %0, %18, %cst_15 {dimension_numbers = #tpu.dot_dimension_numbers<[1], [0], [0], [1], [0, 0, 1, 1], [], []>} : vector<128x128xbf16>, vector<128x128xbf16>, vector<128x128xf32> -> vector<128x128xf32>
    %c0_16 = arith.constant 0 : index
    %c0_17 = arith.constant 0 : index
    %20 = vector.load %arg5[%c0_16, %c0_17] : memref<8x128xbf16, #tpu.memory_space<vmem>>, vector<8x128xbf16>
    %21 = arith.truncf %19 : vector<128x128xf32> to vector<128x128xbf16>
    %cst_18 = arith.constant dense<0.000000e+00> : vector<8x128xf32>
    %22 = tpu.matmul %20, %21, %cst_18 {dimension_numbers = #tpu.dot_dimension_numbers<[1], [0], [0], [1], [0, 0, 1, 1], [], []>} : vector<8x128xbf16>, vector<128x128xbf16>, vector<8x128xf32> -> vector<8x128xf32>
    %23 = arith.truncf %22 : vector<8x128xf32> to vector<8x128xbf16>
    %c0_19 = arith.constant 0 : index
    %c0_20 = arith.constant 0 : index
    %24 = vector.load %arg6[%c0_19, %c0_20] : memref<128x128xbf16, #tpu.memory_space<vmem>>, vector<128x128xbf16>
    %cst_21 = arith.constant dense<0.000000e+00> : vector<8x128xf32>
    %25 = tpu.matmul %23, %24, %cst_21 {dimension_numbers = #tpu.dot_dimension_numbers<[1], [0], [0], [1], [0, 0, 1, 1], [], []>} : vector<8x128xbf16>, vector<128x128xbf16>, vector<8x128xf32> -> vector<8x128xf32>
    %c0_22 = arith.constant 0 : index
    %c0_23 = arith.constant 0 : index
    %26 = vector.load %arg7[%c0_22, %c0_23] : memref<8x128xf32, #tpu.memory_space<vmem>>, vector<8x128xf32>
    %27 = arith.addf %25, %26 : vector<8x128xf32>
    %cst_24 = arith.constant 0.000000e+00 : f32
    %28 = vector.broadcast %cst_24 : f32 to vector<8x128xf32>
    %29 = arith.maximumf %27, %28 : vector<8x128xf32>
    %30 = arith.truncf %29 : vector<8x128xf32> to vector<8x128xbf16>
    %c0_25 = arith.constant 0 : index
    %c0_26 = arith.constant 0 : index
    %31 = vector.load %arg8[%c0_25, %c0_26] : memref<128x128xbf16, #tpu.memory_space<vmem>>, vector<128x128xbf16>
    %cst_27 = arith.constant dense<0.000000e+00> : vector<8x128xf32>
    %32 = tpu.matmul %30, %31, %cst_27 {dimension_numbers = #tpu.dot_dimension_numbers<[1], [0], [0], [1], [0, 0, 1, 1], [], []>} : vector<8x128xbf16>, vector<128x128xbf16>, vector<8x128xf32> -> vector<8x128xf32>
    %c0_28 = arith.constant 0 : index
    %c0_29 = arith.constant 0 : index
    %33 = vector.load %arg9[%c0_28, %c0_29] : memref<8x128xf32, #tpu.memory_space<vmem>>, vector<8x128xf32>
    %34 = arith.addf %32, %33 : vector<8x128xf32>
    %c0_30 = arith.constant 0 : index
    %c0_31 = arith.constant 0 : index
    %35 = vector.load %arg10[%c0_30, %c0_31] : memref<8x128xf32, #tpu.memory_space<vmem>>, vector<8x128xf32>
    tpu.vector_store %arg10[%c0_30, %c0_31], %34 {strides = array<i32>} : memref<8x128xf32, #tpu.memory_space<vmem>>, vector<8x128xf32>,
    return
  }
}

</mosaic_0001>

<bundles_post_ra>
// kernel: gcn_forward.1
= control target key start
LH: loop header
LB: loop body
LE: loop exit
PB: predicated region body
PF: predicated region fallthrough
CT: control target
= control target key end

     0   :  { %s1478_s2 = inlined_call_operand.vmem [shape: bf16[128,128], index: 2, kind: input, shape index: {}]   ;;  %s1479_s1 = inlined_call_operand.vmem [shape: bf16[128,128], index: 1, kind: input, shape index: {}]   ;;  %s1480_s0 = inlined_call_operand.vmem [shape: bf16[128,128], index: 0, kind: input, shape index: {}]   ;;  %s1481_s3 = inlined_call_operand.vmem [shape: bf16[128,128], index: 3, kind: input, shape index: {}]   ;;  %s1482_s4 = inlined_call_operand.vmem [shape: bf16[128,128], index: 4, kind: input, shape index: {}]   ;;  %s1483_s6 = inlined_call_operand.vmem [shape: bf16[128,128], index: 6, kind: input, shape index: {}]   ;;  %s1484_s5 = inlined_call_operand.vmem [shape: bf16[8,128], index: 5, kind: input, shape index: {}]   ;;  %s1485_s8 = inlined_call_operand.vmem [shape: bf16[128,128], index: 8, kind: input, shape index: {}]   ;;  %s1486_s7 = inlined_call_operand.vmem [shape: f32[8,128], index: 7, kind: input, shape index: {}]   ;;  %s1487_s9 = inlined_call_operand.vmem [shape: f32[8,128], index: 9, kind: input, shape index: {}]   ;;  %s1488_s10 = inlined_call_operand.vmem [shape: f32[8,128], index: 10, kind: output, shape index: {}]  }
   0x1   :  { %v1154_v0 = vld [vmem:[%s1478_s2 + $0x38] sm:$0xff]  ;;  %v1153_v1 = vld [vmem:[%s1478_s2 + $0x30] sm:$0xff]  ;;  %v1152_v2 = vld [vmem:[%s1478_s2 + $0x28] sm:$0xff] }
   0x2   :  { %179 = vmatpush.bf16.msra.mxu0 %v1154_v0  ;;  %1187 = vmatpush.bf16.msra.mxu3 %v1154_v0  ;;  %v1151_v3 = vld [vmem:[%s1478_s2 + $0x20] sm:$0xff]  ;;  %v1150_v4 = vld [vmem:[%s1478_s2 + $0x18] sm:$0xff]  ;;  %v1149_v5 = vld [vmem:[%s1478_s2 + $0x10] sm:$0xff] }
   0x3   :  { %v1148_v6 = vld [vmem:[%s1478_s2 + $0x8] sm:$0xff]  ;;  %v1147_v7 = vld [vmem:[%s1478_s2] sm:$0xff]  ;;  %v1145_v11 = vld [vmem:[%s1479_s1 + $0x30] sm:$0xff] }
   0x4   :  { %v1139_v8 = vld [vmem:[%s1479_s1] sm:$0xff]  ;;  %v1144_v9 = vld [vmem:[%s1479_s1 + $0x28] sm:$0xff]  ;;  %v1141_v12 = vld [vmem:[%s1479_s1 + $0x10] sm:$0xff] }
   0x5   :  { %v1140_v10 = vld [vmem:[%s1479_s1 + $0x8] sm:$0xff]  ;;  %v1146_v13 = vld [vmem:[%s1479_s1 + $0x38] sm:$0xff]  ;;  %v1143_v15 = vld [vmem:[%s1479_s1 + $0x20] sm:$0xff] }
   0x6   :  { %180 = vmatpush.bf16.msra.mxu0 %v1153_v1  ;;  %1188 = vmatpush.bf16.msra.mxu3 %v1153_v1  ;;  %v1142_v14 = vld [vmem:[%s1479_s1 + $0x18] sm:$0xff]  ;;  %v1309_v40 = vld [vmem:[%s1480_s0] sm:$0xff]  ;;  %v1315_v41 = vld [vmem:[%s1480_s0 + $0x8] sm:$0xff] }
   0x7   :  { %v1321_v42 = vld [vmem:[%s1480_s0 + $0x10] sm:$0xff]  ;;  %v1327_v43 = vld [vmem:[%s1480_s0 + $0x28] sm:$0xff]  ;;  %v1162_v44 = vld [vmem:[%s1481_s3 + $0x38] sm:$0xff] }
   0x8   :  { %v1161_v45 = vld [vmem:[%s1481_s3 + $0x30] sm:$0xff]  ;;  %v1160_v46 = vld [vmem:[%s1481_s3 + $0x28] sm:$0xff]  ;;  %v1342_v47 = vld [vmem:[%s1480_s0 + $0x18] sm:$0xff] }
   0x9   :  { %v1159_v48 = vld [vmem:[%s1481_s3 + $0x20] sm:$0xff]  ;;  %v1350_v49 = vld [vmem:[%s1480_s0 + $0x30] sm:$0xff]  ;;  %v1158_v50 = vld [vmem:[%s1481_s3 + $0x18] sm:$0xff] }
   0xa   :  { %181 = vmatpush.bf16.msra.mxu0 %v1152_v2  ;;  %1189 = vmatpush.bf16.msra.mxu3 %v1152_v2  ;;  %v1360_v51 = vld [vmem:[%s1480_s0 + $0x20] sm:$0xff]  ;;  %v1365_v52 = vld [vmem:[%s1480_s0 + $0x38] sm:$0xff]  ;;  %v1157_v53 = vld [vmem:[%s1481_s3 + $0x10] sm:$0xff] }
   0xb   :  { %v1156_v54 = vld [vmem:[%s1481_s3 + $0x8] sm:$0xff]  ;;  %v1155_v55 = vld [vmem:[%s1481_s3] sm:$0xff] }
   0xe   :  { %182 = vmatpush.bf16.msra.mxu0 %v1151_v3  ;;  %1190 = vmatpush.bf16.msra.mxu3 %v1151_v3 }
  0x12   :  { %183 = vmatpush.bf16.msra.mxu0 %v1150_v4  ;;  %1191 = vmatpush.bf16.msra.mxu3 %v1150_v4 }
  0x16   :  { %184 = vmatpush.bf16.msra.mxu0 %v1149_v5  ;;  %1192 = vmatpush.bf16.msra.mxu3 %v1149_v5 }
  0x1a   :  { %185 = vmatpush.bf16.msra.mxu0 %v1148_v6  ;;  %1193 = vmatpush.bf16.msra.mxu3 %v1148_v6 }
  0x1e   :  { %186 = vmatpush.bf16.msra.mxu0 %v1147_v7  ;;  %1194 = vmatpush.bf16.msra.mxu3 %v1147_v7 }
  0x21   :  { %187 = vmatmul.bf16.vlgmr.msra.gmra.mxu0 %v1139_v8  ;;  %212 = vmatmul.bf16.vlgmr.msra.gmra.mxu3 %v1144_v9 }
  0x31   :  { %192 = vmatmul.bf16.gmra.mxu0 %v1140_v10  ;;  %217 = vmatmul.bf16.gmra.mxu3 %v1145_v11 }
  0x41   :  { %197 = vmatmul.bf16.gmra.mxu0 %v1141_v12  ;;  %222 = vmatmul.bf16.gmra.mxu3 %v1146_v13 }
  0x51   :  { %202 = vmatmul.bf16.gmra.mxu0 %v1142_v14 }
  0x61   :  { %207 = vmatmul.bf16.gmra.mxu0 %v1143_v15 }
  0x9e   :  { %v188_v16 = vpop.f32.mrf.mxu0 }
  0xa4   :  { %v213_v17 = vpop.f32.mrf.mxu3 }
  0xa6   :  { %v190_v18 = vpop.f32.mrf.mxu0 }
  0xa7   :  { %v228_v39 = vpack.c.bf16 %v190_v18, %v188_v16 }
  0xac   :  { %v215_v19 = vpop.f32.mrf.mxu3 }
  0xad   :  { %v233_v31 = vpack.c.bf16 %v215_v19, %v213_v17 }
  0xae   :  { %v193_v20 = vpop.f32.mrf.mxu0 }
  0xb4   :  { %v218_v21 = vpop.f32.mrf.mxu3 }
  0xb6   :  { %v195_v22 = vpop.f32.mrf.mxu0 }
  0xb7   :  { %v229_v38 = vpack.c.bf16 %v195_v22, %v193_v20 }
  0xbc   :  { %v220_v23 = vpop.f32.mrf.mxu3 }
  0xbd   :  { %v234_v30 = vpack.c.bf16 %v220_v23, %v218_v21 }
  0xbe   :  { %v198_v24 = vpop.f32.mrf.mxu0 }
  0xc4   :  { %v223_v25 = vpop.f32.mrf.mxu3 }
  0xc6   :  { %v200_v26 = vpop.f32.mrf.mxu0 }
  0xc7   :  { %v230_v37 = vpack.c.bf16 %v200_v26, %v198_v24 }
  0xcc   :  { %v225_v27 = vpop.f32.mrf.mxu3 }
  0xcd   :  { %v235_v28 = vpack.c.bf16 %v225_v27, %v223_v25 }
  0xce   :  { %v203_v29 = vpop.f32.mrf.mxu0 }
  0xcf   :  { %284 = vmatpush.bf16.msra.mxu1 %v235_v28  ;;  %1195 = vmatpush.bf16.msra.mxu2 %v235_v28 }
  0xd3   :  { %285 = vmatpush.bf16.msra.mxu1 %v234_v30  ;;  %1196 = vmatpush.bf16.msra.mxu2 %v234_v30 }
  0xd6   :  { %v205_v32 = vpop.f32.mrf.mxu0 }
  0xd7   :  { %286 = vmatpush.bf16.msra.mxu1 %v233_v31  ;;  %1197 = vmatpush.bf16.msra.mxu2 %v233_v31  ;;  %v231_v36 = vpack.c.bf16 %v205_v32, %v203_v29 }
  0xde   :  { %v208_v33 = vpop.f32.mrf.mxu0 }
  0xe6   :  { %v210_v34 = vpop.f32.mrf.mxu0 }
  0xe7   :  { %v232_v35 = vpack.c.bf16 %v210_v34, %v208_v33 }
  0xe9   :  { %287 = vmatpush.bf16.msra.mxu1 %v232_v35  ;;  %1198 = vmatpush.bf16.msra.mxu2 %v232_v35 }
  0xed   :  { %288 = vmatpush.bf16.msra.mxu1 %v231_v36  ;;  %1199 = vmatpush.bf16.msra.mxu2 %v231_v36 }
  0xf1   :  { %289 = vmatpush.bf16.msra.mxu1 %v230_v37  ;;  %1200 = vmatpush.bf16.msra.mxu2 %v230_v37 }
  0xf5   :  { %290 = vmatpush.bf16.msra.mxu1 %v229_v38  ;;  %1201 = vmatpush.bf16.msra.mxu2 %v229_v38 }
  0xf9   :  { %291 = vmatpush.bf16.msra.mxu1 %v228_v39  ;;  %1202 = vmatpush.bf16.msra.mxu2 %v228_v39 }
  0xfc   :  { %292 = vmatmul.bf16.vlgmr.msra.gmra.mxu1 %v1309_v40  ;;  %317 = vmatmul.bf16.vlgmr.msra.gmra.mxu2 %v1327_v43 }
  0xfd   :  { %421 = vmatpush.bf16.msrb.mxu2 %v1162_v44 }
 0x101   :  { %422 = vmatpush.bf16.msrb.mxu2 %v1161_v45 }
 0x105   :  { %423 = vmatpush.bf16.msrb.mxu2 %v1160_v46 }
 0x109   :  { %424 = vmatpush.bf16.msrb.mxu2 %v1159_v48 }
 0x10c   :  { %297 = vmatmul.bf16.gmra.mxu1 %v1315_v41  ;;  %322 = vmatmul.bf16.gmra.mxu2 %v1350_v49 }
 0x10d   :  { %425 = vmatpush.bf16.msrb.mxu2 %v1158_v50 }
 0x111   :  { %426 = vmatpush.bf16.msrb.mxu2 %v1157_v53 }
 0x115   :  { %427 = vmatpush.bf16.msrb.mxu2 %v1156_v54 }
 0x119   :  { %428 = vmatpush.bf16.msrb.mxu2 %v1155_v55 }
 0x11c   :  { %302 = vmatmul.bf16.gmra.mxu1 %v1321_v42  ;;  %327 = vmatmul.bf16.gmra.mxu2 %v1365_v52 }
 0x12c   :  { %307 = vmatmul.bf16.gmra.mxu1 %v1342_v47 }
 0x13c   :  { %312 = vmatmul.bf16.gmra.mxu1 %v1360_v51 }
 0x179   :  { %v293_v56 = vpop.f32.mrf.mxu1 }
 0x17a   :  { %v333_v58 = vmax.f32 %v293_v56, 0.0 }
 0x17f   :  { %v318_v13 = vpop.f32.mrf.mxu2 }
 0x180   :  { %v343_v20 = vmax.f32 %v318_v13, 0.0 }
 0x181   :  { %v295_v57 = vpop.f32.mrf.mxu1 }
 0x182   :  { %v334_v59 = vmax.f32 %v295_v57, 0.0 }
 0x184   :  { %v349_v60 = vpack.c.bf16 %v334_v59, %v333_v58 }
 0x186   :  { %429 = vmatmul.bf16.vlgmr.msrb.gmra.mxu2 %v349_v60 }
 0x187   :  { %v320_v18 = vpop.f32.mrf.mxu2 }
 0x188   :  { %v344_v21 = vmax.f32 %v320_v18, 0.0 }
 0x189   :  { %v298_v61 = vpop.f32.mrf.mxu1 }
 0x18a   :  { %v335_v63 = vmax.f32 %v298_v61, 0.0  ;;  %v354_v22 = vpack.c.bf16 %v344_v21, %v343_v20 }
 0x18f   :  { %v323_v19 = vpop.f32.mrf.mxu2 }
 0x190   :  { %v345_v24 = vmax.f32 %v323_v19, 0.0 }
 0x191   :  { %v300_v62 = vpop.f32.mrf.mxu1 }
 0x192   :  { %v336_v0 = vmax.f32 %v300_v62, 0.0 }
 0x194   :  { %v350_v1 = vpack.c.bf16 %v336_v0, %v335_v63  ;;  %v1170_v0 = vld [vmem:[%s1482_s4 + $0x38] sm:$0xff] }
 0x195   :  { %615 = vmatpush.bf16.msrb.mxu0 %v1170_v0 }
 0x196   :  { %434 = vmatmul.bf16.gmra.mxu2 %v350_v1  ;;  %v1169_v1 = vld [vmem:[%s1482_s4 + $0x30] sm:$0xff] }
 0x197   :  { %v325_v23 = vpop.f32.mrf.mxu2 }
 0x198   :  { %v346_v25 = vmax.f32 %v325_v23, 0.0 }
 0x199   :  { %v303_v2 = vpop.f32.mrf.mxu1  ;;  %616 = vmatpush.bf16.msrb.mxu0 %v1169_v1 }
 0x19a   :  { %v337_v4 = vmax.f32 %v303_v2, 0.0  ;;  %v355_v27 = vpack.c.bf16 %v346_v25, %v345_v24  ;;  %v1168_v2 = vld [vmem:[%s1482_s4 + $0x28] sm:$0xff] }
 0x19d   :  { %617 = vmatpush.bf16.msrb.mxu0 %v1168_v2 }
 0x19f   :  { %v328_v26 = vpop.f32.mrf.mxu2 }
 0x1a0   :  { %v347_v29 = vmax.f32 %v328_v26, 0.0 }
 0x1a1   :  { %v305_v3 = vpop.f32.mrf.mxu1 }
 0x1a2   :  { %v338_v5 = vmax.f32 %v305_v3, 0.0  ;;  %v1167_v3 = vld [vmem:[%s1482_s4 + $0x20] sm:$0xff] }
 0x1a3   :  { %618 = vmatpush.bf16.msrb.mxu0 %v1167_v3 }
 0x1a4   :  { %v351_v6 = vpack.c.bf16 %v338_v5, %v337_v4  ;;  %v1166_v4 = vld [vmem:[%s1482_s4 + $0x18] sm:$0xff]  ;;  %v1165_v5 = vld [vmem:[%s1482_s4 + $0x10] sm:$0xff] }
 0x1a6   :  { %439 = vmatmul.bf16.gmra.mxu2 %v351_v6  ;;  %v1164_v6 = vld [vmem:[%s1482_s4 + $0x8] sm:$0xff] }
 0x1a7   :  { %v330_v28 = vpop.f32.mrf.mxu2  ;;  %619 = vmatpush.bf16.msrb.mxu0 %v1166_v4 }
 0x1a8   :  { %v348_v30 = vmax.f32 %v330_v28, 0.0 }
 0x1a9   :  { %v308_v7 = vpop.f32.mrf.mxu1 }
 0x1aa   :  { %v339_v9 = vmax.f32 %v308_v7, 0.0  ;;  %v356_v31 = vpack.c.bf16 %v348_v30, %v347_v29  ;;  %v1163_v7 = vld [vmem:[%s1482_s4] sm:$0xff] }
 0x1ab   :  { %620 = vmatpush.bf16.msrb.mxu0 %v1165_v5 }
 0x1af   :  { %621 = vmatpush.bf16.msrb.mxu0 %v1164_v6 }
 0x1b1   :  { %v310_v8 = vpop.f32.mrf.mxu1 }
 0x1b2   :  { %v340_v10 = vmax.f32 %v310_v8, 0.0 }
 0x1b3   :  { %622 = vmatpush.bf16.msrb.mxu0 %v1163_v7 }
 0x1b4   :  { %v352_v11 = vpack.c.bf16 %v340_v10, %v339_v9 }
 0x1b6   :  { %444 = vmatmul.bf16.gmra.mxu2 %v352_v11 }
 0x1b9   :  { %v313_v12 = vpop.f32.mrf.mxu1 }
 0x1ba   :  { %v341_v15 = vmax.f32 %v313_v12, 0.0 }
 0x1c1   :  { %v315_v14 = vpop.f32.mrf.mxu1 }
 0x1c2   :  { %v342_v16 = vmax.f32 %v315_v14, 0.0 }
 0x1c4   :  { %v353_v17 = vpack.c.bf16 %v342_v16, %v341_v15 }
 0x1c6   :  { %449 = vmatmul.bf16.gmra.mxu2 %v353_v17 }
 0x1d6   :  { %454 = vmatmul.bf16.gmra.mxu2 %v354_v22 }
 0x1e6   :  { %459 = vmatmul.bf16.gmra.mxu2 %v355_v27 }
 0x1f6   :  { %464 = vmatmul.bf16.gmra.mxu2 %v356_v31 }
 0x209   :  { %v430_v32 = vpop.f32.mrf.mxu2 }
 0x211   :  { %v432_v33 = vpop.f32.mrf.mxu2 }
 0x212   :  { %v470_v34 = vpack.c.bf16 %v432_v33, %v430_v32 }
 0x219   :  { %v435_v35 = vpop.f32.mrf.mxu2 }
 0x221   :  { %v437_v36 = vpop.f32.mrf.mxu2 }
 0x222   :  { %v471_v37 = vpack.c.bf16 %v437_v36, %v435_v35 }
 0x229   :  { %v440_v38 = vpop.f32.mrf.mxu2 }
 0x231   :  { %v442_v39 = vpop.f32.mrf.mxu2 }
 0x232   :  { %v472_v44 = vpack.c.bf16 %v442_v39, %v440_v38 }
 0x239   :  { %v445_v45 = vpop.f32.mrf.mxu2 }
 0x241   :  { %v447_v46 = vpop.f32.mrf.mxu2 }
 0x242   :  { %v473_v48 = vpack.c.bf16 %v447_v46, %v445_v45 }
 0x249   :  { %v450_v50 = vpop.f32.mrf.mxu2 }
 0x251   :  { %v452_v53 = vpop.f32.mrf.mxu2 }
 0x252   :  { %v474_v63 = vpack.c.bf16 %v452_v53, %v450_v50 }
 0x259   :  { %v455_v54 = vpop.f32.mrf.mxu2 }
 0x261   :  { %v457_v55 = vpop.f32.mrf.mxu2 }
 0x262   :  { %v475_v62 = vpack.c.bf16 %v457_v55, %v455_v54 }
 0x269   :  { %v460_v56 = vpop.f32.mrf.mxu2 }
 0x271   :  { %v462_v57 = vpop.f32.mrf.mxu2 }
 0x272   :  { %v476_v61 = vpack.c.bf16 %v462_v57, %v460_v56 }
 0x279   :  { %v465_v58 = vpop.f32.mrf.mxu2 }
 0x281   :  { %v467_v59 = vpop.f32.mrf.mxu2 }
 0x282   :  { %v477_v60 = vpack.c.bf16 %v467_v59, %v465_v58 }
 0x284   :  { %478 = vmatpush.bf16.msrb.mxu3 %v477_v60 }
 0x288   :  { %479 = vmatpush.bf16.msrb.mxu3 %v476_v61 }
 0x28c   :  { %480 = vmatpush.bf16.msrb.mxu3 %v475_v62 }
 0x290   :  { %481 = vmatpush.bf16.msrb.mxu3 %v474_v63 }
 0x294   :  { %482 = vmatpush.bf16.msrb.mxu3 %v473_v48 }
 0x298   :  { %483 = vmatpush.bf16.msrb.mxu3 %v472_v44 }
 0x29c   :  { %484 = vmatpush.bf16.msrb.mxu3 %v471_v37 }
 0x2a0   :  { %485 = vmatpush.bf16.msrb.mxu3 %v470_v34 }
 0x2a3   :  { %486 = vmatmul.bf16.vlgmr.msrb.gmra.mxu3 %v1309_v40 }
 0x2b3   :  { %491 = vmatmul.bf16.gmra.mxu3 %v1315_v41 }
 0x2c3   :  { %496 = vmatmul.bf16.gmra.mxu3 %v1321_v42 }
 0x2d3   :  { %501 = vmatmul.bf16.gmra.mxu3 %v1342_v47 }
 0x2e3   :  { %506 = vmatmul.bf16.gmra.mxu3 %v1360_v51 }
 0x2f3   :  { %511 = vmatmul.bf16.gmra.mxu3 %v1327_v43 }
 0x303   :  { %516 = vmatmul.bf16.gmra.mxu3 %v1350_v49 }
 0x313   :  { %521 = vmatmul.bf16.gmra.mxu3 %v1365_v52 }
 0x326   :  { %v487_v8 = vpop.f32.mrf.mxu3 }
 0x327   :  { %v527_v10 = vmax.f32 %v487_v8, 0.0 }
 0x32e   :  { %v489_v9 = vpop.f32.mrf.mxu3 }
 0x32f   :  { %v528_v11 = vmax.f32 %v489_v9, 0.0 }
 0x331   :  { %v543_v12 = vpack.c.bf16 %v528_v11, %v527_v10 }
 0x333   :  { %623 = vmatmul.bf16.vlgmr.msrb.gmra.mxu0 %v543_v12 }
 0x336   :  { %v492_v13 = vpop.f32.mrf.mxu3 }
 0x337   :  { %v529_v15 = vmax.f32 %v492_v13, 0.0 }
 0x33e   :  { %v494_v14 = vpop.f32.mrf.mxu3 }
 0x33f   :  { %v530_v16 = vmax.f32 %v494_v14, 0.0 }
 0x341   :  { %v544_v17 = vpack.c.bf16 %v530_v16, %v529_v15 }
 0x343   :  { %628 = vmatmul.bf16.gmra.mxu0 %v544_v17 }
 0x346   :  { %v497_v18 = vpop.f32.mrf.mxu3 }
 0x347   :  { %v531_v20 = vmax.f32 %v497_v18, 0.0 }
 0x34e   :  { %v499_v19 = vpop.f32.mrf.mxu3 }
 0x34f   :  { %v532_v21 = vmax.f32 %v499_v19, 0.0 }
 0x351   :  { %v545_v22 = vpack.c.bf16 %v532_v21, %v531_v20 }
 0x353   :  { %633 = vmatmul.bf16.gmra.mxu0 %v545_v22 }
 0x356   :  { %v502_v23 = vpop.f32.mrf.mxu3 }
 0x357   :  { %v533_v25 = vmax.f32 %v502_v23, 0.0 }
 0x35e   :  { %v504_v24 = vpop.f32.mrf.mxu3 }
 0x35f   :  { %v534_v26 = vmax.f32 %v504_v24, 0.0 }
 0x361   :  { %v546_v27 = vpack.c.bf16 %v534_v26, %v533_v25 }
 0x363   :  { %638 = vmatmul.bf16.gmra.mxu0 %v546_v27 }
 0x366   :  { %v507_v28 = vpop.f32.mrf.mxu3 }
 0x367   :  { %v535_v30 = vmax.f32 %v507_v28, 0.0 }
 0x36e   :  { %v509_v29 = vpop.f32.mrf.mxu3 }
 0x36f   :  { %v536_v31 = vmax.f32 %v509_v29, 0.0  ;;  %v1178_v29 = vld [vmem:[%s1483_s6 + $0x38] sm:$0xff] }
 0x370   :  { %809 = vmatpush.bf16.msra.mxu3 %v1178_v29 }
 0x371   :  { %v547_v32 = vpack.c.bf16 %v536_v31, %v535_v30  ;;  %v1177_v30 = vld [vmem:[%s1483_s6 + $0x30] sm:$0xff] }
 0x373   :  { %643 = vmatmul.bf16.gmra.mxu0 %v547_v32  ;;  %v1176_v32 = vld [vmem:[%s1483_s6 + $0x28] sm:$0xff] }
 0x374   :  { %810 = vmatpush.bf16.msra.mxu3 %v1177_v30 }
 0x376   :  { %v512_v33 = vpop.f32.mrf.mxu3 }
 0x377   :  { %v537_v35 = vmax.f32 %v512_v33, 0.0 }
 0x378   :  { %811 = vmatpush.bf16.msra.mxu3 %v1176_v32 }
 0x37e   :  { %v514_v34 = vpop.f32.mrf.mxu3 }
 0x37f   :  { %v538_v36 = vmax.f32 %v514_v34, 0.0  ;;  %v1175_v34 = vld [vmem:[%s1483_s6 + $0x20] sm:$0xff] }
 0x380   :  { %812 = vmatpush.bf16.msra.mxu3 %v1175_v34 }
 0x381   :  { %v548_v37 = vpack.c.bf16 %v538_v36, %v537_v35  ;;  %v1174_v36 = vld [vmem:[%s1483_s6 + $0x18] sm:$0xff] }
 0x383   :  { %648 = vmatmul.bf16.gmra.mxu0 %v548_v37  ;;  %v1173_v37 = vld [vmem:[%s1483_s6 + $0x10] sm:$0xff] }
 0x384   :  { %813 = vmatpush.bf16.msra.mxu3 %v1174_v36 }
 0x386   :  { %v517_v38 = vpop.f32.mrf.mxu3 }
 0x387   :  { %v539_v44 = vmax.f32 %v517_v38, 0.0  ;;  %v1172_v38 = vld [vmem:[%s1483_s6 + $0x8] sm:$0xff] }
 0x388   :  { %814 = vmatpush.bf16.msra.mxu3 %v1173_v37 }
 0x38c   :  { %815 = vmatpush.bf16.msra.mxu3 %v1172_v38 }
 0x38e   :  { %v519_v39 = vpop.f32.mrf.mxu3 }
 0x38f   :  { %v540_v45 = vmax.f32 %v519_v39, 0.0  ;;  %v1171_v39 = vld [vmem:[%s1483_s6] sm:$0xff] }
 0x390   :  { %816 = vmatpush.bf16.msra.mxu3 %v1171_v39 }
 0x391   :  { %v549_v46 = vpack.c.bf16 %v540_v45, %v539_v44  ;;  %v721_v44 = vld [vmem:[%s1484_s5] sm:$0xf]  ;;  %v1186_v45 = vld [vmem:[%s1485_s8 + $0x38] sm:$0xff] }
 0x393   :  { %653 = vmatmul.bf16.gmra.mxu0 %v549_v46  ;;  %v1185_v46 = vld [vmem:[%s1485_s8 + $0x30] sm:$0xff] }
 0x396   :  { %v522_v48 = vpop.f32.mrf.mxu3 }
 0x397   :  { %v541_v53 = vmax.f32 %v522_v48, 0.0  ;;  %v1184_v48 = vld [vmem:[%s1485_s8 + $0x28] sm:$0xff] }
 0x39e   :  { %v524_v50 = vpop.f32.mrf.mxu3 }
 0x39f   :  { %v542_v54 = vmax.f32 %v524_v50, 0.0  ;;  %v1183_v50 = vld [vmem:[%s1485_s8 + $0x20] sm:$0xff] }
 0x3a1   :  { %v550_v55 = vpack.c.bf16 %v542_v54, %v541_v53  ;;  %v1182_v53 = vld [vmem:[%s1485_s8 + $0x18] sm:$0xff]  ;;  %v1181_v54 = vld [vmem:[%s1485_s8 + $0x10] sm:$0xff] }
 0x3a3   :  { %658 = vmatmul.bf16.gmra.mxu0 %v550_v55 }
 0x3b0   :  { %v624_v56 = vpop.f32.mrf.mxu0 }
 0x3b8   :  { %v626_v57 = vpop.f32.mrf.mxu0 }
 0x3b9   :  { %v664_v58 = vpack.c.bf16 %v626_v57, %v624_v56 }
 0x3c0   :  { %v629_v59 = vpop.f32.mrf.mxu0 }
 0x3c8   :  { %v631_v60 = vpop.f32.mrf.mxu0 }
 0x3c9   :  { %v665_v61 = vpack.c.bf16 %v631_v60, %v629_v59  ;;  %v1179_v59 = vld [vmem:[%s1485_s8] sm:$0xff] }
 0x3ca   :  { %v760_v60 = vld [vmem:[%s1486_s7] sm:$0xff] }
 0x3d0   :  { %v634_v62 = vpop.f32.mrf.mxu0 }
 0x3d8   :  { %v636_v63 = vpop.f32.mrf.mxu0 }
 0x3d9   :  { %v666_v0 = vpack.c.bf16 %v636_v63, %v634_v62 }
 0x3e0   :  { %v639_v1 = vpop.f32.mrf.mxu0 }
 0x3e8   :  { %v641_v2 = vpop.f32.mrf.mxu0 }
 0x3e9   :  { %v667_v3 = vpack.c.bf16 %v641_v2, %v639_v1  ;;  %v840_v2 = vld [vmem:[%s1487_s9] sm:$0xff] }
 0x3f0   :  { %v644_v4 = vpop.f32.mrf.mxu0 }
 0x3f8   :  { %v646_v5 = vpop.f32.mrf.mxu0 }
 0x3f9   :  { %v668_v15 = vpack.c.bf16 %v646_v5, %v644_v4 }
 0x400   :  { %v649_v6 = vpop.f32.mrf.mxu0 }
 0x408   :  { %v651_v7 = vpop.f32.mrf.mxu0 }
 0x409   :  { %v669_v14 = vpack.c.bf16 %v651_v7, %v649_v6 }
 0x410   :  { %v654_v8 = vpop.f32.mrf.mxu0 }
 0x418   :  { %v656_v9 = vpop.f32.mrf.mxu0 }
 0x419   :  { %v670_v13 = vpack.c.bf16 %v656_v9, %v654_v8 }
 0x420   :  { %v659_v10 = vpop.f32.mrf.mxu0 }
 0x428   :  { %v661_v11 = vpop.f32.mrf.mxu0 }
 0x429   :  { %v671_v12 = vpack.c.bf16 %v661_v11, %v659_v10 }
 0x42b   :  { %672 = vmatpush.bf16.msrb.mxu1 %v671_v12 }
 0x42f   :  { %673 = vmatpush.bf16.msrb.mxu1 %v670_v13 }
 0x433   :  { %674 = vmatpush.bf16.msrb.mxu1 %v669_v14 }
 0x437   :  { %675 = vmatpush.bf16.msrb.mxu1 %v668_v15 }
 0x43b   :  { %676 = vmatpush.bf16.msrb.mxu1 %v667_v3 }
 0x43f   :  { %677 = vmatpush.bf16.msrb.mxu1 %v666_v0 }
 0x443   :  { %678 = vmatpush.bf16.msrb.mxu1 %v665_v61 }
 0x447   :  { %679 = vmatpush.bf16.msrb.mxu1 %v664_v58  ;;  %v1180_v58 = vld [vmem:[%s1485_s8 + $0x8] sm:$0xff] }
 0x44a   :  { %680 = vmatmul.bf16.vlgmr.msrb.gmra.mxu1 %v1309_v40 }
 0x45a   :  { %685 = vmatmul.bf16.gmra.mxu1 %v1315_v41 }
 0x46a   :  { %690 = vmatmul.bf16.gmra.mxu1 %v1321_v42 }
 0x47a   :  { %695 = vmatmul.bf16.gmra.mxu1 %v1342_v47 }
 0x48a   :  { %700 = vmatmul.bf16.gmra.mxu1 %v1360_v51 }
 0x49a   :  { %705 = vmatmul.bf16.gmra.mxu1 %v1327_v43 }
 0x4aa   :  { %710 = vmatmul.bf16.gmra.mxu1 %v1350_v49 }
 0x4ba   :  { %715 = vmatmul.bf16.gmra.mxu1 %v1365_v52 }
 0x4c7   :  { %v681_v16 = vpop.f32.mrf.mxu1 }
 0x4cf   :  { %v683_v17 = vpop.f32.mrf.mxu1 }
 0x4d0   :  { %v722_v18 = vpack.c.bf16 %v683_v17, %v681_v16 }
 0x4d7   :  { %v686_v19 = vpop.f32.mrf.mxu1 }
 0x4df   :  { %v688_v20 = vpop.f32.mrf.mxu1 }
 0x4e0   :  { %v723_v40 = vpack.c.bf16 %v688_v20, %v686_v19 }
 0x4e7   :  { %v691_v21 = vpop.f32.mrf.mxu1 }
 0x4ef   :  { %v693_v41 = vpop.f32.mrf.mxu1 }
 0x4f0   :  { %v724_v22 = vpack.c.bf16 %v693_v41, %v691_v21 }
 0x4f7   :  { %v696_v42 = vpop.f32.mrf.mxu1 }
 0x4ff   :  { %v698_v23 = vpop.f32.mrf.mxu1 }
 0x500   :  { %v725_v47 = vpack.c.bf16 %v698_v23, %v696_v42 }
 0x507   :  { %v701_v24 = vpop.f32.mrf.mxu1 }
 0x50f   :  { %v703_v51 = vpop.f32.mrf.mxu1 }
 0x510   :  { %v726_v35 = vpack.c.bf16 %v703_v51, %v701_v24 }
 0x517   :  { %v706_v25 = vpop.f32.mrf.mxu1 }
 0x51f   :  { %v708_v43 = vpop.f32.mrf.mxu1 }
 0x520   :  { %v727_v33 = vpack.c.bf16 %v708_v43, %v706_v25 }
 0x527   :  { %v711_v26 = vpop.f32.mrf.mxu1 }
 0x52f   :  { %v713_v49 = vpop.f32.mrf.mxu1 }
 0x530   :  { %v728_v31 = vpack.c.bf16 %v713_v49, %v711_v26 }
 0x537   :  { %v716_v27 = vpop.f32.mrf.mxu1 }
 0x53f   :  { %v718_v52 = vpop.f32.mrf.mxu1 }
 0x540   :  { %v729_v28 = vpack.c.bf16 %v718_v52, %v716_v27 }
 0x542   :  { %730 = vmatpush.bf16.msra.mxu2 %v729_v28 }
 0x546   :  { %731 = vmatpush.bf16.msra.mxu2 %v728_v31 }
 0x54a   :  { %732 = vmatpush.bf16.msra.mxu2 %v727_v33 }
 0x54e   :  { %733 = vmatpush.bf16.msra.mxu2 %v726_v35 }
 0x552   :  { %734 = vmatpush.bf16.msra.mxu2 %v725_v47 }
 0x556   :  { %735 = vmatpush.bf16.msra.mxu2 %v724_v22 }
 0x55a   :  { %736 = vmatpush.bf16.msra.mxu2 %v723_v40 }
 0x55e   :  { %737 = vmatpush.bf16.msra.mxu2 %v722_v18 }
 0x561   :  { %738 = vmatmul.bf16.vlgmr.msra.gmra.mxu2 %v721_v44 }
 0x562   :  { %889 = vmatpush.bf16.msrb.mxu2 %v1186_v45 }
 0x566   :  { %890 = vmatpush.bf16.msrb.mxu2 %v1185_v46 }
 0x56a   :  { %891 = vmatpush.bf16.msrb.mxu2 %v1184_v48 }
 0x56e   :  { %892 = vmatpush.bf16.msrb.mxu2 %v1183_v50 }
 0x572   :  { %893 = vmatpush.bf16.msrb.mxu2 %v1182_v53 }
 0x576   :  { %894 = vmatpush.bf16.msrb.mxu2 %v1181_v54 }
 0x57a   :  { %895 = vmatpush.bf16.msrb.mxu2 %v1180_v58 }
 0x57e   :  { %896 = vmatpush.bf16.msrb.mxu2 %v1179_v59 }
 0x5e4   :  { %v739_v55 = vpop.f32.mrf.mxu2 }
 0x5e5   :  { %v743_v56 = vpack.c.bf16 %v739_v55, %v739_v55 }
 0x5e7   :  { %817 = vmatmul.bf16.vlgmr.msra.gmra.mxu3 %v743_v56 }
 0x5ec   :  { %v741_v57 = vpop.f32.mrf.mxu2 }
 0x66a   :  { %v818_v61 = vpop.f32.mrf.mxu3 }
 0x66b   :  { %v819_v62 = vadd.f32 %v818_v61, %v760_v60 }
 0x66d   :  { %v822_v63 = vmax.f32 %v819_v62, 0.0 }
 0x66f   :  { %v823_v0 = vpack.c.bf16 %v822_v63, %v822_v63 }
 0x671   :  { %897 = vmatmul.bf16.vlgmr.msrb.gmra.mxu2 %v823_v0 }
 0x672   :  { %v820_v1 = vpop.f32.mrf.mxu3 }
 0x6f4   :  { %v898_v3 = vpop.f32.mrf.mxu2 }
 0x6f5   :  { %v899_v4 = vadd.f32 %v898_v3, %v840_v2 }
 0x6f7   :  { %902 = vst [vmem:[%s1488_s10] sm:$0xff] %v899_v4 }
 0x6fc   :  { %v900_v5 = vpop.f32.mrf.mxu2 }

</bundles_post_ra>
